<compile_context>
chip_gen: v7x
topology: tpu7x:2x2x1
jax: 0.10.0
libtpu: 0.0.40
codegen_flags: <defaults>
</compile_context>

<pallas_src>
import numpy as np
import jax
import jax.numpy as jnp
from jax import lax
from jax.experimental import pallas as pl
from jax.experimental.pallas import tpu as pltpu


# ---------------------------------------------------------------------------
# Kernel
# ---------------------------------------------------------------------------
def eresblock_kernel(x_ref, w1_ref, b1_ref, w2_ref, b2_ref, w3_ref, b3_ref,
                     out_ref):
    """One (Nb, H, W*C) batch block per grid step.

    x_ref  : (Nb, H, W*C)   unpadded input, lane-dense (channels fastest)
    w1_ref : (W*C, 3*W*C)   banded 3x3 conv #1 weights, cols = [ky=0|ky=1|ky=2]
    b1_ref : (1, W*C)
    w2_ref : (W*C, 3*W*C)   banded 3x3 conv #2 weights
    b2_ref : (1, W*C)
    w3_ref : (W*C, W*C)     block-diagonal 1x1 conv weights
    b3_ref : (1, W*C)
    out_ref: (Nb, H, W*C)
    """
    Nb, H, WC = out_ref.shape
    M = Nb * H

    # (Nb, H, WC) -> (Nb*H, WC): free view change (lane layout preserved,
    # H is a multiple of 8 so sublane tiles line up).
    x = x_ref[...].reshape(M, WC)

    # Boundary-row masks: computed once, reused by both 3x3 convs.  They zero
    # the ky=0 / ky=2 contributions at the first / last row of EACH image, so
    # the roll-based row shift cannot leak rows across batch elements.
    row_in_img = lax.broadcasted_iota(jnp.int32, (M, WC), 0) % H
    not_top = row_in_img != 0          # rows with a valid row above (h-1)
    not_bot = row_in_img != H - 1      # rows with a valid row below (h+1)

    def conv3x3(src, w_ref, b_ref):
        # One MXU matmul covers all 3 kx taps and all input channels (folded
        # into the banded weight columns) for all 3 ky taps at once.
        y = jnp.dot(src, w_ref[...], preferred_element_type=jnp.float32)
        y0 = y[:, 0 * WC:1 * WC]       # ky = 0  -> needs row h-1
        y1 = y[:, 1 * WC:2 * WC]       # ky = 1  -> row h
        y2 = y[:, 2 * WC:3 * WC]       # ky = 2  -> needs row h+1
        # Row shifts on the XLU (roll), boundary rows zeroed on the VPU:
        # implements the zero padding along H without masked vld/vst copies.
        y0s = jnp.where(not_top, pltpu.roll(y0, shift=1, axis=0), 0.0)
        y2s = jnp.where(not_bot, pltpu.roll(y2, shift=M - 1, axis=0), 0.0)
        return b_ref[...] + y1 + y0s + y2s

    # conv1 (3x3, pad 1) + ReLU
    t = jnp.maximum(conv3x3(x, w1_ref, b1_ref), 0.0)
    # conv2 (3x3, pad 1) + ReLU
    t = jnp.maximum(conv3x3(t, w2_ref, b2_ref), 0.0)
    # conv3 (1x1, block-diagonal matmul)
    t = jnp.dot(t, w3_ref[...], preferred_element_type=jnp.float32) + b3_ref[...]
    # residual add + final ReLU; full-lane unmasked store
    out_ref[...] = jnp.maximum(t + x, 0.0).reshape(Nb, H, WC)


# ---------------------------------------------------------------------------
# One-time parameter packing (hoisted out of the per-call path)
# ---------------------------------------------------------------------------
def _band3x3(w_oihw, W, C):
    """Pack a PyTorch (O, I, 3, 3) conv weight into a (W*C, 3*W*C) banded
    matrix acting on a lane-dense (·, W*C) row: columns [ky*W*C:(ky+1)*W*C]
    hold the ky-th tap.  Zero padding along W is encoded by clipping the band.
    """
    wt = jnp.transpose(w_oihw, (2, 3, 1, 0)).astype(jnp.float32)  # (ky,kx,ci,co)
    mats = []
    for dy in range(3):
        m = jnp.zeros((W * C, W * C), jnp.float32)
        for dx in range(3):
            # selector S[w+dx-1, w] = 1 ; entries falling outside are dropped
            # by eye's diagonal clipping == zero padding along W.
            sel = jnp.eye(W, W, 1 - dx, dtype=jnp.float32)
            m = m + jnp.kron(sel, wt[dy, dx])
        mats.append(m)
    return jnp.concatenate(mats, axis=1)                          # (W*C, 3*W*C)


def pack_params(w1, b1, w2, b2, w3, b3, *, W, C):
    """Repack PyTorch-layout conv weights into the banded / block-diagonal
    matrices the kernel consumes.  Pure setup -- call ONCE when the parameters
    are created, not on every forward call."""
    assert w1.shape == (C, C, 3, 3) and w2.shape == (C, C, 3, 3)
    assert w3.shape == (C, C, 1, 1)
    WC = W * C
    w1k = _band3x3(w1, W, C)                                       # (WC, 3*WC)
    w2k = _band3x3(w2, W, C)                                       # (WC, 3*WC)
    w3k = jnp.kron(jnp.eye(W, dtype=jnp.float32),
                   jnp.transpose(w3[:, :, 0, 0]).astype(jnp.float32))  # (WC, WC)
    b1k = jnp.tile(b1.astype(jnp.float32), W).reshape(1, WC)
    b2k = jnp.tile(b2.astype(jnp.float32), W).reshape(1, WC)
    b3k = jnp.tile(b3.astype(jnp.float32), W).reshape(1, WC)
    return jax.block_until_ready((w1k, b1k, w2k, b2k, w3k, b3k))


# ---------------------------------------------------------------------------
# Block-size selection
# ---------------------------------------------------------------------------
def _choose_block_n(N, H, WC, act_budget_bytes=16 * 1024 * 1024, min_rows=256):
    """Largest batch-block that fits the activation VMEM budget (in+out block,
    double-buffered => 4x bytes per image).  Only split into >=2 grid steps
    (so both v7x TensorCores get work) when each step still has >= min_rows
    matmul rows; otherwise one big step wins (per-step overhead ~0.35us)."""
    per_image = H * WC * 4                             # f32 bytes
    nb = min(N, max(1, act_budget_bytes // (4 * per_image)))
    while N % nb:
        nb -= 1
    if N // nb < 2:
        half = nb // 2
        while half >= 1 and N % half:
            half -= 1
        if half >= 1 and half * H >= min_rows:
            nb = half
    return nb


# ---------------------------------------------------------------------------
# Wrappers
# ---------------------------------------------------------------------------
def eresidual_block_nobn_lane_dense(x_lane, packed, *, H, W, C, block_n=None):
    """Core entry point: x_lane is the lane-dense (N, H, W*C) activation."""
    N = x_lane.shape[0]
    WC = W * C
    assert x_lane.shape == (N, H, WC)
    assert WC % 128 == 0, "W*C must be a multiple of 128 (lane alignment)"
    assert H % 8 == 0, "H must be a multiple of 8 (sublane alignment)"
    w1k, b1k, w2k, b2k, w3k, b3k = packed

    nb = _choose_block_n(N, H, WC) if block_n is None else block_n
    assert N % nb == 0
    grid = (N // nb,)

    return pl.pallas_call(
        eresblock_kernel,
        out_shape=jax.ShapeDtypeStruct((N, H, WC), jnp.float32),
        grid_spec=pltpu.PrefetchScalarGridSpec(
            num_scalar_prefetch=0,
            grid=grid,
            in_specs=[
                pl.BlockSpec((nb, H, WC), lambda n: (n, 0, 0)),    # x
                pl.BlockSpec((WC, 3 * WC), lambda n: (0, 0)),      # w1 banded
                pl.BlockSpec((1, WC), lambda n: (0, 0)),           # b1
                pl.BlockSpec((WC, 3 * WC), lambda n: (0, 0)),      # w2 banded
                pl.BlockSpec((1, WC), lambda n: (0, 0)),           # b2
                pl.BlockSpec((WC, WC), lambda n: (0, 0)),          # w3 block-diag
                pl.BlockSpec((1, WC), lambda n: (0, 0)),           # b3
            ],
            out_specs=pl.BlockSpec((nb, H, WC), lambda n: (n, 0, 0)),
        ),
        compiler_params=pltpu.CompilerParams(
            dimension_semantics=("parallel",),
            # v5e's scoped-VMEM default is only 16 MiB; 32 MiB is safe on all
            # generations (<= v7x's 64 MiB physical) and covers the ~16 MiB
            # activation budget + ~1 MiB of double-buffered weights.
            vmem_limit_bytes=32 * 1024 * 1024,
        ),
    )(x_lane, w1k, b1k, w2k, b2k, w3k, b3k)


def eresidual_block_nobn_nchw(x_nchw, packed, *, block_n=None):
    """Thin NCHW adapter (glue for the PyTorch layout / reference check).
    Production callers should feed the lane-dense (N, H, W*C) layout directly
    and skip these two transposes (they are extra HBM passes)."""
    N, C, H, W = x_nchw.shape
    x_lane = jnp.transpose(x_nchw, (0, 2, 3, 1)).astype(jnp.float32)
    x_lane = x_lane.reshape(N, H, W * C)
    out = eresidual_block_nobn_lane_dense(x_lane, packed, H=H, W=W, C=C,
                                          block_n=block_n)
    return jnp.transpose(out.reshape(N, H, W, C), (0, 3, 1, 2))


# ---------------------------------------------------------------------------
# Pure-JAX reference (mirrors the PyTorch module, NCHW / OIHW)
# ---------------------------------------------------------------------------
def _ref_forward(x, w1, b1, w2, b2, w3, b3):
    def conv(x, w, b, pad):
        y = lax.conv_general_dilated(
            x, w, window_strides=(1, 1), padding=[(pad, pad), (pad, pad)],
            dimension_numbers=("NCHW", "OIHW", "NCHW"))
        return y + b[None, :, None, None]

    t = jax.nn.relu(conv(x, w1, b1, 1))
    t = jax.nn.relu(conv(t, w2, b2, 1))
    t = conv(t, w3, b3, 0)
    return jax.nn.relu(t + x)


if __name__ == "__main__":
    # in_channels == out_channels (required by the residual add); W*C = 128.
    N, C, H, W = 2, 8, 16, 16

    key = jax.random.PRNGKey(0)
    ks = jax.random.split(key, 7)
    x = jax.random.normal(ks[0], (N, C, H, W), jnp.float32)
    w1 = 0.1 * jax.random.normal(ks[1], (C, C, 3, 3), jnp.float32)
    b1 = 0.1 * jax.random.normal(ks[2], (C,), jnp.float32)
    w2 = 0.1 * jax.random.normal(ks[3], (C, C, 3, 3), jnp.float32)
    b2 = 0.1 * jax.random.normal(ks[4], (C,), jnp.float32)
    w3 = 0.1 * jax.random.normal(ks[5], (C, C, 1, 1), jnp.float32)
    b3 = 0.1 * jax.random.normal(ks[6], (C,), jnp.float32)

    # One-time parameter packing (hoisted out of the forward path).
    packed = pack_params(w1, b1, w2, b2, w3, b3, W=W, C=C)

    out = eresidual_block_nobn_nchw(x, packed)
    out = jax.block_until_ready(out)

    ref = jax.block_until_ready(_ref_forward(x, w1, b1, w2, b2, w3, b3))
    assert out.shape == (N, C, H, W) and out.dtype == jnp.float32
    np.testing.assert_allclose(np.asarray(out), np.asarray(ref),
                               rtol=1e-4, atol=1e-4)

    print("KERNEL_OK")
</pallas_src>

<mosaic_0001>
module attributes {stable_mosaic.version = 11 : i64} {
  func.func @eresblock_kernel(%arg0: i32, %arg1: memref<2x16x128xf32, #tpu.memory_space<vmem>>, %arg2: memref<128x384xf32, #tpu.memory_space<vmem>>, %arg3: memref<1x128xf32, #tpu.memory_space<vmem>>, %arg4: memref<128x384xf32, #tpu.memory_space<vmem>>, %arg5: memref<1x128xf32, #tpu.memory_space<vmem>>, %arg6: memref<128x128xf32, #tpu.memory_space<vmem>>, %arg7: memref<1x128xf32, #tpu.memory_space<vmem>>, %arg8: memref<2x16x128xf32, #tpu.memory_space<vmem>>) attributes {dimension_semantics = [#tpu.dimension_semantics<parallel>], iteration_bounds = array<i64: 1>, scalar_prefetch = 0 : i64, scratch_operands = 0 : i64, tpu.core_type = #tpu.core_type<tc>, window_params = [{transform_indices = @transform_0, window_bounds = array<i64: 2, 16, 128>}, {pipeline_mode = #tpu.pipeline_mode<synchronous>, transform_indices = @transform_1, window_bounds = array<i64: 128, 384>}, {pipeline_mode = #tpu.pipeline_mode<synchronous>, transform_indices = @transform_2, window_bounds = array<i64: 1, 128>}, {pipeline_mode = #tpu.pipeline_mode<synchronous>, transform_indices = @transform_3, window_bounds = array<i64: 128, 384>}, {pipeline_mode = #tpu.pipeline_mode<synchronous>, transform_indices = @transform_4, window_bounds = array<i64: 1, 128>}, {pipeline_mode = #tpu.pipeline_mode<synchronous>, transform_indices = @transform_5, window_bounds = array<i64: 128, 128>}, {pipeline_mode = #tpu.pipeline_mode<synchronous>, transform_indices = @transform_6, window_bounds = array<i64: 1, 128>}, {transform_indices = @transform_7, window_bounds = array<i64: 2, 16, 128>}]} {
    %c0 = arith.constant 0 : index
    %c0_0 = arith.constant 0 : index
    %c0_1 = arith.constant 0 : index
    %0 = vector.load %arg1[%c0, %c0_0, %c0_1] : memref<2x16x128xf32, #tpu.memory_space<vmem>>, vector<2x16x128xf32>
    %1 = vector.shape_cast %0 : vector<2x16x128xf32> to vector<32x128xf32>
    %2 = tpu.iota {dimensions = array<i32: 0>} : vector<32x128xi32>
    %c16_i32 = arith.constant 16 : i32
    %c0_i32 = arith.constant 0 : i32
    %3 = arith.cmpi eq, %c16_i32, %c0_i32 : i32
    %c1_i32 = arith.constant 1 : i32
    %4 = arith.select %3, %c1_i32, %c16_i32 : i32
    %5 = vector.broadcast %4 : i32 to vector<32x128xi32>
    %6 = arith.remsi %2, %5 : vector<32x128xi32>
    %c0_i32_2 = arith.constant 0 : i32
    %7 = vector.broadcast %c0_i32_2 : i32 to vector<32x128xi32>
    %8 = arith.cmpi ne, %6, %7 : vector<32x128xi32>
    %c0_i32_3 = arith.constant 0 : i32
    %9 = vector.broadcast %c0_i32_3 : i32 to vector<32x128xi32>
    %10 = arith.cmpi slt, %6, %9 : vector<32x128xi32>
    %c0_i32_4 = arith.constant 0 : i32
    %11 = arith.cmpi slt, %4, %c0_i32_4 : i32
    %12 = vector.broadcast %11 : i1 to vector<32x128xi1>
    %13 = vector.broadcast %12 : vector<32x128xi1> to vector<32x128xi1>
    %14 = arith.xori %10, %13 : vector<32x128xi1>
    %15 = arith.andi %14, %8 : vector<32x128xi1>
    %16 = vector.broadcast %4 : i32 to vector<32x128xi32>
    %17 = arith.addi %6, %16 : vector<32x128xi32>
    %18 = arith.select %15, %17, %6 : vector<32x128xi1>, vector<32x128xi32>
    %c0_i32_5 = arith.constant 0 : i32
    %19 = vector.broadcast %c0_i32_5 : i32 to vector<32x128xi32>
    %20 = arith.cmpi ne, %18, %19 : vector<32x128xi32>
    %c15_i32 = arith.constant 15 : i32
    %21 = vector.broadcast %c15_i32 : i32 to vector<32x128xi32>
    %22 = arith.cmpi ne, %18, %21 : vector<32x128xi32>
    %c0_6 = arith.constant 0 : index
    %c0_7 = arith.constant 0 : index
    %23 = vector.load %arg2[%c0_6, %c0_7] : memref<128x384xf32, #tpu.memory_space<vmem>>, vector<128x384xf32>
    %cst = arith.constant dense<0.000000e+00> : vector<32x384xf32>
    %24 = tpu.matmul %1, %23, %cst {dimension_numbers = #tpu.dot_dimension_numbers<[1], [0], [0], [1], [0, 0, 1, 1], [], []>} : vector<32x128xf32>, vector<128x384xf32>, vector<32x384xf32> -> vector<32x384xf32>
    %25 = vector.extract_strided_slice %24 {offsets = [0, 0], sizes = [32, 128], strides = [1, 1]} : vector<32x384xf32> to vector<32x128xf32>
    %26 = vector.extract_strided_slice %24 {offsets = [0, 128], sizes = [32, 128], strides = [1, 1]} : vector<32x384xf32> to vector<32x128xf32>
    %27 = vector.extract_strided_slice %24 {offsets = [0, 256], sizes = [32, 128], strides = [1, 1]} : vector<32x384xf32> to vector<32x128xf32>
    %c1_i32_8 = arith.constant 1 : i32
    %28 = tpu.dynamic_rotate %25 by %c1_i32_8 dim 0 : vector<32x128xf32>, i32 -> vector<32x128xf32>
    %cst_9 = arith.constant 0.000000e+00 : f32
    %29 = vector.broadcast %cst_9 : f32 to vector<32x128xf32>
    %30 = arith.select %20, %28, %29 : vector<32x128xi1>, vector<32x128xf32>
    %c31_i32 = arith.constant 31 : i32
    %31 = tpu.dynamic_rotate %27 by %c31_i32 dim 0 : vector<32x128xf32>, i32 -> vector<32x128xf32>
    %cst_10 = arith.constant 0.000000e+00 : f32
    %32 = vector.broadcast %cst_10 : f32 to vector<32x128xf32>
    %33 = arith.select %22, %31, %32 : vector<32x128xi1>, vector<32x128xf32>
    %c0_11 = arith.constant 0 : index
    %c0_12 = arith.constant 0 : index
    %34 = vector.load %arg3[%c0_11, %c0_12] : memref<1x128xf32, #tpu.memory_space<vmem>>, vector<1x128xf32>
    %35 = vector.broadcast %34 : vector<1x128xf32> to vector<32x128xf32>
    %36 = arith.addf %35, %26 : vector<32x128xf32>
    %37 = arith.addf %36, %30 : vector<32x128xf32>
    %38 = arith.addf %37, %33 : vector<32x128xf32>
    %cst_13 = arith.constant 0.000000e+00 : f32
    %39 = vector.broadcast %cst_13 : f32 to vector<32x128xf32>
    %40 = arith.maximumf %38, %39 : vector<32x128xf32>
    %c0_14 = arith.constant 0 : index
    %c0_15 = arith.constant 0 : index
    %41 = vector.load %arg4[%c0_14, %c0_15] : memref<128x384xf32, #tpu.memory_space<vmem>>, vector<128x384xf32>
    %cst_16 = arith.constant dense<0.000000e+00> : vector<32x384xf32>
    %42 = tpu.matmul %40, %41, %cst_16 {dimension_numbers = #tpu.dot_dimension_numbers<[1], [0], [0], [1], [0, 0, 1, 1], [], []>} : vector<32x128xf32>, vector<128x384xf32>, vector<32x384xf32> -> vector<32x384xf32>
    %43 = vector.extract_strided_slice %42 {offsets = [0, 0], sizes = [32, 128], strides = [1, 1]} : vector<32x384xf32> to vector<32x128xf32>
    %44 = vector.extract_strided_slice %42 {offsets = [0, 128], sizes = [32, 128], strides = [1, 1]} : vector<32x384xf32> to vector<32x128xf32>
    %45 = vector.extract_strided_slice %42 {offsets = [0, 256], sizes = [32, 128], strides = [1, 1]} : vector<32x384xf32> to vector<32x128xf32>
    %c1_i32_17 = arith.constant 1 : i32
    %46 = tpu.dynamic_rotate %43 by %c1_i32_17 dim 0 : vector<32x128xf32>, i32 -> vector<32x128xf32>
    %cst_18 = arith.constant 0.000000e+00 : f32
    %47 = vector.broadcast %cst_18 : f32 to vector<32x128xf32>
    %48 = arith.select %20, %46, %47 : vector<32x128xi1>, vector<32x128xf32>
    %c31_i32_19 = arith.constant 31 : i32
    %49 = tpu.dynamic_rotate %45 by %c31_i32_19 dim 0 : vector<32x128xf32>, i32 -> vector<32x128xf32>
    %cst_20 = arith.constant 0.000000e+00 : f32
    %50 = vector.broadcast %cst_20 : f32 to vector<32x128xf32>
    %51 = arith.select %22, %49, %50 : vector<32x128xi1>, vector<32x128xf32>
    %c0_21 = arith.constant 0 : index
    %c0_22 = arith.constant 0 : index
    %52 = vector.load %arg5[%c0_21, %c0_22] : memref<1x128xf32, #tpu.memory_space<vmem>>, vector<1x128xf32>
    %53 = vector.broadcast %52 : vector<1x128xf32> to vector<32x128xf32>
    %54 = arith.addf %53, %44 : vector<32x128xf32>
    %55 = arith.addf %54, %48 : vector<32x128xf32>
    %56 = arith.addf %55, %51 : vector<32x128xf32>
    %cst_23 = arith.constant 0.000000e+00 : f32
    %57 = vector.broadcast %cst_23 : f32 to vector<32x128xf32>
    %58 = arith.maximumf %56, %57 : vector<32x128xf32>
    %c0_24 = arith.constant 0 : index
    %c0_25 = arith.constant 0 : index
    %59 = vector.load %arg6[%c0_24, %c0_25] : memref<128x128xf32, #tpu.memory_space<vmem>>, vector<128x128xf32>
    %cst_26 = arith.constant dense<0.000000e+00> : vector<32x128xf32>
    %60 = tpu.matmul %58, %59, %cst_26 {dimension_numbers = #tpu.dot_dimension_numbers<[1], [0], [0], [1], [0, 0, 1, 1], [], []>} : vector<32x128xf32>, vector<128x128xf32>, vector<32x128xf32> -> vector<32x128xf32>
    %c0_27 = arith.constant 0 : index
    %c0_28 = arith.constant 0 : index
    %61 = vector.load %arg7[%c0_27, %c0_28] : memref<1x128xf32, #tpu.memory_space<vmem>>, vector<1x128xf32>
    %62 = vector.broadcast %61 : vector<1x128xf32> to vector<32x128xf32>
    %63 = arith.addf %60, %62 : vector<32x128xf32>
    %64 = arith.addf %63, %1 : vector<32x128xf32>
    %cst_29 = arith.constant 0.000000e+00 : f32
    %65 = vector.broadcast %cst_29 : f32 to vector<32x128xf32>
    %66 = arith.maximumf %64, %65 : vector<32x128xf32>
    %67 = vector.shape_cast %66 : vector<32x128xf32> to vector<2x16x128xf32>
    %c0_30 = arith.constant 0 : index
    %c0_31 = arith.constant 0 : index
    %c0_32 = arith.constant 0 : index
    %68 = vector.load %arg8[%c0_30, %c0_31, %c0_32] : memref<2x16x128xf32, #tpu.memory_space<vmem>>, vector<2x16x128xf32>
    tpu.vector_store %arg8[%c0_30, %c0_31, %c0_32], %67 {strides = array<i32>} : memref<2x16x128xf32, #tpu.memory_space<vmem>>, vector<2x16x128xf32>,
    return
  }
  func.func @transform_0(%arg0: i32) -> (i32, i32, i32) {
    %c0_i32 = arith.constant 0 : i32
    %c0_i32_0 = arith.constant 0 : i32
    %c0_i32_1 = arith.constant 0 : i32
    return %arg0, %c0_i32, %c0_i32_0 : i32, i32, i32
  }
  func.func @transform_1(%arg0: i32) -> (i32, i32) {
    %c0_i32 = arith.constant 0 : i32
    %c0_i32_0 = arith.constant 0 : i32
    %c0_i32_1 = arith.constant 0 : i32
    return %c0_i32, %c0_i32_0 : i32, i32
  }
  func.func @transform_2(%arg0: i32) -> (i32, i32) {
    %c0_i32 = arith.constant 0 : i32
    %c0_i32_0 = arith.constant 0 : i32
    %c0_i32_1 = arith.constant 0 : i32
    return %c0_i32, %c0_i32_0 : i32, i32
  }
  func.func @transform_3(%arg0: i32) -> (i32, i32) {
    %c0_i32 = arith.constant 0 : i32
    %c0_i32_0 = arith.constant 0 : i32
    %c0_i32_1 = arith.constant 0 : i32
    return %c0_i32, %c0_i32_0 : i32, i32
  }
  func.func @transform_4(%arg0: i32) -> (i32, i32) {
    %c0_i32 = arith.constant 0 : i32
    %c0_i32_0 = arith.constant 0 : i32
    %c0_i32_1 = arith.constant 0 : i32
    return %c0_i32, %c0_i32_0 : i32, i32
  }
  func.func @transform_5(%arg0: i32) -> (i32, i32) {
    %c0_i32 = arith.constant 0 : i32
    %c0_i32_0 = arith.constant 0 : i32
    %c0_i32_1 = arith.constant 0 : i32
    return %c0_i32, %c0_i32_0 : i32, i32
  }
  func.func @transform_6(%arg0: i32) -> (i32, i32) {
    %c0_i32 = arith.constant 0 : i32
    %c0_i32_0 = arith.constant 0 : i32
    %c0_i32_1 = arith.constant 0 : i32
    return %c0_i32, %c0_i32_0 : i32, i32
  }
  func.func @transform_7(%arg0: i32) -> (i32, i32, i32) {
    %c0_i32 = arith.constant 0 : i32
    %c0_i32_0 = arith.constant 0 : i32
    %c0_i32_1 = arith.constant 0 : i32
    return %arg0, %c0_i32, %c0_i32_0 : i32, i32, i32
  }
}

</mosaic_0001>

<bundles_post_ra>
// kernel: tpu_custom_call.1
= control target key start
LH: loop header
LB: loop body
LE: loop exit
PB: predicated region body
PF: predicated region fallthrough
CT: control target
= control target key end

     0   :  { %12 = vsyncpa [#allocation3], 0  ;;  %s1554_s0 = inlined_call_operand.hbm [shape: f32[2,16,128], index: 0, kind: input, shape index: {}]   ;;  %s1555_s1 = inlined_call_operand.hbm [shape: f32[128,384], index: 1, kind: input, shape index: {}]   ;;  %s1556_s2 = inlined_call_operand.vmem [shape: f32[1,128], index: 2, kind: input, shape index: {}]   ;;  %s1557_s3 = inlined_call_operand.hbm [shape: f32[128,384], index: 3, kind: input, shape index: {}]   ;;  %s1558_s4 = inlined_call_operand.vmem [shape: f32[1,128], index: 4, kind: input, shape index: {}]   ;;  %s1559_s5 = inlined_call_operand.hbm [shape: f32[128,128], index: 5, kind: input, shape index: {}]   ;;  %s1560_s6 = inlined_call_operand.vmem [shape: f32[1,128], index: 6, kind: input, shape index: {}]   ;;  %s1561_s7 = inlined_call_operand.hbm [shape: f32[2,16,128], index: 7, kind: output, shape index: {}]  }
   0x1   :  { %13 = vsyncpa [#allocation6], 0 }
   0x2   :  { %14 = vsyncpa [#allocation9], 0 }
   0x3   :  { %15 = vsyncpa [#allocation4], 0  ;;  %s1307_s24 = smov [#allocation5]   ;;  %s1189_s28 = scalar_lea.hbm %s1555_s1, 6144 }
   0x4   :  { %s33_s25 = sshll.u32 %s1307_s24, 4  ;;  %p1190_p0 = scmp.ne.s32.totalorder %s1555_s1, %s1189_s28  ;;  %s34_s25 = int_to_ptr.vmem [resolvable:$true] %s33_s25 }
   0x5   :  { %p1193_p1 = scmp.lt.u32.totalorder %s1189_s28, %s1555_s1 }
   0x7   :  { %p1195_p2 = pnand %p1193_p1, %p1190_p0 }
   0x9   :  { %1198 = shalt.err (!%p1195_p2)
}
   0xa   :  { %s1199_s10 = scalar_lea.vmem %s34_s25, 6144  ;;  %p1204_p4 = scmp.lt.s32.totalorder %s34_s25, %s34_s25 }
   0xb   :  { %p1200_p3 = scmp.ne.s32.totalorder %s34_s25, %s1199_s10  ;;  %p1205_p5 = scmp.lt.s32.totalorder %s1199_s10, %s1199_s10 }
   0xd   :  { %p1206_p6 = por %p1205_p5, %p1204_p4 }
   0xf   :  { %p1207_p7 = pnand %p1206_p6, %p1200_p3 }
  0x11   :  { %1210 = shalt.err (!%p1207_p7)
}
  0x12   :  { %s1308_s11 = smov 384   ;;  %s1309_s12 = smov 24  }
  0x13   :  { %39 = dma.hbm_to_vmem [thread:$0]  %s1555_s1, 6144, %s34_s25, [#allocation6], %s1308_s11, %s1308_s11, %s1309_s12  }
  0x14   :  { %s1310_s15 = smov [#allocation2]   ;;  %s1211_s19 = scalar_lea.hbm %s1554_s0, 512 }
  0x15   :  { %s21_s16 = sshll.u32 %s1310_s15, 4  ;;  %p1212_p8 = scmp.ne.s32.totalorder %s1554_s0, %s1211_s19  ;;  %s22_s16 = int_to_ptr.vmem [resolvable:$true] %s21_s16 }
  0x16   :  { %p1215_p9 = scmp.lt.u32.totalorder %s1211_s19, %s1554_s0 }
  0x18   :  { %p1217_p10 = pnand %p1215_p9, %p1212_p8 }
  0x1a   :  { %1220 = shalt.err (!%p1217_p10)
}
  0x1b   :  { %s1221_s24 = scalar_lea.vmem %s22_s16, 512  ;;  %p1226_p12 = scmp.lt.s32.totalorder %s22_s16, %s22_s16 }
  0x1c   :  { %p1222_p11 = scmp.ne.s32.totalorder %s22_s16, %s1221_s24  ;;  %p1227_p13 = scmp.lt.s32.totalorder %s1221_s24, %s1221_s24 }
  0x1e   :  { %p1228_p0 = por %p1227_p13, %p1226_p12 }
  0x20   :  { %p1229_p1 = pnand %p1228_p0, %p1222_p11 }
  0x22   :  { %1232 = shalt.err (!%p1229_p1)
}
  0x23   :  { %s1311_s1 = smov 128   ;;  %s1312_s25 = smov 8  }
  0x24   :  { %27 = dma.hbm_to_vmem [thread:$0]  %s1554_s0, 512, %s22_s16, [#allocation3], %s1311_s1, %s1311_s1, %s1312_s25  }
  0x25   :  { %s1313_s28 = smov [#allocation7]   ;;  %s1314_s30 = smov [#allocation8]  }
  0x26   :  { %s47_s29 = sshll.u32 %s1313_s28, 4  ;;  %s61_s8 = sshll.u32 %s1314_s30, 4  ;;  %s48_s29 = int_to_ptr.vmem [resolvable:$true] %s47_s29  ;;  %s1387_s8 = int_to_ptr.vmem [resolvable:$true] %s61_s8 }
  0x27   :  { %s1233_s13 = scalar_lea.hbm %s1557_s3, 6144 }
  0x28   :  { %p1234_p2 = scmp.ne.s32.totalorder %s1557_s3, %s1233_s13  ;;  %p1237_p3 = scmp.lt.u32.totalorder %s1233_s13, %s1557_s3 }
  0x2a   :  { %p1239_p4 = pnand %p1237_p3, %p1234_p2 }
  0x2c   :  { %1242 = shalt.err (!%p1239_p4)
}
  0x2d   :  { %s1243_s0 = scalar_lea.vmem %s48_s29, 6144  ;;  %p1248_p6 = scmp.lt.s32.totalorder %s48_s29, %s48_s29 }
  0x2e   :  { %p1244_p5 = scmp.ne.s32.totalorder %s48_s29, %s1243_s0  ;;  %p1249_p7 = scmp.lt.s32.totalorder %s1243_s0, %s1243_s0 }
  0x30   :  { %p1250_p8 = por %p1249_p7, %p1248_p6 }
  0x32   :  { %p1251_p9 = pnand %p1250_p8, %p1244_p5 }
  0x34   :  { %1254 = shalt.err (!%p1251_p9)
}
  0x35   :  { %53 = dma.hbm_to_vmem [thread:$0]  %s1557_s3, 6144, %s48_s29, [#allocation6], %s1308_s11, %s1308_s11, %s1309_s12  }
  0x36   :  { %s1255_s22 = scalar_lea.hbm %s1559_s5, 2048 }
  0x37   :  { %p1256_p10 = scmp.ne.s32.totalorder %s1559_s5, %s1255_s22  ;;  %p1259_p11 = scmp.lt.u32.totalorder %s1255_s22, %s1559_s5 }
  0x39   :  { %p1261_p12 = pnand %p1259_p11, %p1256_p10 }
  0x3b   :  { %1264 = shalt.err (!%p1261_p12)
}
  0x3c   :  { %s1265_s28 = scalar_lea.vmem %s1387_s8, 2048  ;;  %p1270_p0 = scmp.lt.s32.totalorder %s1387_s8, %s1387_s8 }
  0x3d   :  { %p1266_p13 = scmp.ne.s32.totalorder %s1387_s8, %s1265_s28  ;;  %p1271_p1 = scmp.lt.s32.totalorder %s1265_s28, %s1265_s28 }
  0x3f   :  { %p1272_p2 = por %p1271_p1, %p1270_p0 }
  0x41   :  { %p1273_p3 = pnand %p1272_p2, %p1266_p13 }
  0x43   :  { %1276 = shalt.err (!%p1273_p3)
}
  0x44   :  { %67 = dma.hbm_to_vmem [thread:$0]  %s1559_s5, 2048, %s1387_s8, [#allocation9], %s1311_s1, %s1311_s1, %s1312_s25  }
  0x45   :  { %1299 = dma.done.wait [#allocation3], 512  }
  0x46   :  { %1300 = vsyncadd [#allocation3], 4294966784 }
  0x47   :  { %1301 = dma.done.wait [#allocation6], 12288  }
  0x48   :  { %1302 = vsyncadd [#allocation6], 4294955008 }
  0x49   :  { %1303 = dma.done.wait [#allocation9], 2048  }
  0x4a   :  { %1304 = vsyncadd [#allocation9], 4294965248  ;;  %v1315_v0 = vmov 0.0   ;;  %v148_v1 = vld [vmem:[#allocation5 + $0x8] sm:$0xff]  ;;  %v151_v2 = vld [vmem:[#allocation5 + $0x20] sm:$0xff]  ;;  %s1316_s8 = smov [#allocation10]  }
  0x4b   :  { %259 = vmatprep.mubr.f32.mxu0 %v1315_v0  ;;  %v149_v3 = vld [vmem:[#allocation5 + $0x10] sm:$0xff]  ;;  %v1003_v4 = vpack.c.bf16 %v151_v2, %v148_v1  ;;  %v152_v5 = vld [vmem:[#allocation5 + $0x28] sm:$0xff]  ;;  %v147_v6 = vld [vmem:[#allocation5] sm:$0xff]  ;;  %s812_s9 = sshll.u32 %s1316_s8, 4  ;;  %s813_s9 = int_to_ptr.vmem [resolvable:$true] %s812_s9 }
  0x4c   :  { %v150_v7 = vld [vmem:[#allocation5 + $0x18] sm:$0xff]  ;;  %v1035_v8 = vpack.c.bf16 %v152_v5, %v149_v3  ;;  %v157_v11 = vld [vmem:[#allocation5 + $0x50] sm:$0xff]  ;;  %v155_v12 = vld [vmem:[#allocation5 + $0x40] sm:$0xff]  ;;  %p1282_p5 = scmp.lt.s32.totalorder %s813_s9, %s813_s9 }
  0x4d   :  { %v1005_v9 = vpack.c.bf16 %v150_v7, %v147_v6  ;;  %v154_v10 = vld [vmem:[#allocation5 + $0x38] sm:$0xff]  ;;  %1004 = vmatprep.subr.bf16.mxu0 %v1003_v4  ;;  %v153_v15 = vld [vmem:[#allocation5 + $0x30] sm:$0xff]  ;;  %v156_v16 = vld [vmem:[#allocation5 + $0x48] sm:$0xff] }
  0x4e   :  { %v1007_v13 = vpack.c.bf16 %v157_v11, %v154_v10  ;;  %v158_v14 = vld [vmem:[#allocation5 + $0x58] sm:$0xff]  ;;  %1036 = vmatprep.subr.bf16.mxu1 %v1035_v8  ;;  %v1009_v18 = vpack.c.bf16 %v156_v16, %v153_v15  ;;  %v160_v19 = vld [vmem:[#allocation5 + $0x68] sm:$0xff]  ;;  %v163_v20 = vld [vmem:[#allocation5 + $0x80] sm:$0xff] }
  0x4f   :  { %1006 = vmatpush1.bf16.msra.mxu0 %v1005_v9  ;;  %v1039_v17 = vpack.c.bf16 %v158_v14, %v155_v12  ;;  %v161_v21 = vld [vmem:[#allocation5 + $0x70] sm:$0xff]  ;;  %1038 = vmatpush3.bf16.msra.mxu1 %v1035_v8  ;;  %v1011_v22 = vpack.c.bf16 %v163_v20, %v160_v19  ;;  %v164_v23 = vld [vmem:[#allocation5 + $0x88] sm:$0xff]  ;;  %v159_v24 = vld [vmem:[#allocation5 + $0x60] sm:$0xff] }
  0x50   :  { %1008 = vmatprep.subr.bf16.mxu0 %v1007_v13  ;;  %v162_v25 = vld [vmem:[#allocation5 + $0x78] sm:$0xff]  ;;  %v1043_v26 = vpack.c.bf16 %v164_v23, %v161_v21  ;;  %v169_v28 = vld [vmem:[#allocation5 + $0xb0] sm:$0xff]  ;;  %v167_v29 = vld [vmem:[#allocation5 + $0xa0] sm:$0xff] }
  0x51   :  { %1040 = vmatprep.subr.bf16.mxu1 %v1039_v17  ;;  %v166_v27 = vld [vmem:[#allocation5 + $0x98] sm:$0xff]  ;;  %v1013_v31 = vpack.c.bf16 %v162_v25, %v159_v24  ;;  %v165_v33 = vld [vmem:[#allocation5 + $0x90] sm:$0xff]  ;;  %v168_v34 = vld [vmem:[#allocation5 + $0xa8] sm:$0xff] }
  0x52   :  { %v170_v30 = vld [vmem:[#allocation5 + $0xb8] sm:$0xff]  ;;  %v1015_v32 = vpack.c.bf16 %v169_v28, %v166_v27  ;;  %v172_v36 = vld [vmem:[#allocation5 + $0xc8] sm:$0xff]  ;;  %v175_v37 = vld [vmem:[#allocation5 + $0xe0] sm:$0xff]  ;;  %v1017_v40 = vpack.c.bf16 %v168_v34, %v165_v33 }
  0x53   :  { %1010 = vmatpush1.bf16.msra.mxu0 %v1009_v18  ;;  %1042 = vmatpush3.bf16.msra.mxu1 %v1039_v17  ;;  %v1047_v35 = vpack.c.bf16 %v170_v30, %v167_v29  ;;  %v173_v38 = vld [vmem:[#allocation5 + $0xd0] sm:$0xff]  ;;  %v176_v39 = vld [vmem:[#allocation5 + $0xe8] sm:$0xff]  ;;  %v1019_v41 = vpack.c.bf16 %v175_v37, %v172_v36  ;;  %v171_v42 = vld [vmem:[#allocation5 + $0xc0] sm:$0xff] }
  0x54   :  { %1012 = vmatprep.subr.bf16.mxu0 %v1011_v22  ;;  %1044 = vmatprep.subr.bf16.mxu1 %v1043_v26  ;;  %v174_v43 = vld [vmem:[#allocation5 + $0xd8] sm:$0xff]  ;;  %v1051_v44 = vpack.c.bf16 %v176_v39, %v173_v38  ;;  %v181_v46 = vld [vmem:[#allocation5 + $0x110] sm:$0xff]  ;;  %v179_v47 = vld [vmem:[#allocation5 + $0x100] sm:$0xff] }
  0x55   :  { %v178_v45 = vld [vmem:[#allocation5 + $0xf8] sm:$0xff]  ;;  %v1021_v49 = vpack.c.bf16 %v174_v43, %v171_v42  ;;  %v1425_v50 = vld [vmem:[#allocation2] sm:$0xff]  ;;  %v177_v52 = vld [vmem:[#allocation5 + $0xf0] sm:$0xff] }
  0x56   :  { %v182_v48 = vld [vmem:[#allocation5 + $0x118] sm:$0xff]  ;;  %v1023_v51 = vpack.c.bf16 %v181_v46, %v178_v45  ;;  %v180_v53 = vld [vmem:[#allocation5 + $0x108] sm:$0xff]  ;;  %v187_v56 = vld [vmem:[#allocation5 + $0x140] sm:$0xff]  ;;  %921 = vmatprep.mubr.f32.mxu1 %v1425_v50 }
  0x57   :  { %1014 = vmatpush1.bf16.msra.mxu0 %v1013_v31  ;;  %1046 = vmatpush3.bf16.msra.mxu1 %v1043_v26  ;;  %v1055_v54 = vpack.c.bf16 %v182_v48, %v179_v47  ;;  %v184_v55 = vld [vmem:[#allocation5 + $0x128] sm:$0xff]  ;;  %v185_v57 = vld [vmem:[#allocation5 + $0x130] sm:$0xff]  ;;  %v1025_v59 = vpack.c.bf16 %v180_v53, %v177_v52  ;;  %v183_v61 = vld [vmem:[#allocation5 + $0x120] sm:$0xff] }
  0x58   :  { %1016 = vmatprep.subr.bf16.mxu0 %v1015_v32  ;;  %1048 = vmatprep.subr.bf16.mxu1 %v1047_v35  ;;  %v188_v58 = vld [vmem:[#allocation5 + $0x148] sm:$0xff]  ;;  %v1027_v60 = vpack.c.bf16 %v187_v56, %v184_v55  ;;  %v186_v62 = vld [vmem:[#allocation5 + $0x138] sm:$0xff]  ;;  %v193_v2 = vld [vmem:[#allocation5 + $0x170] sm:$0xff] }
  0x59   :  { %v1059_v63 = vpack.c.bf16 %v188_v58, %v185_v57  ;;  %v190_v1 = vld [vmem:[#allocation5 + $0x158] sm:$0xff]  ;;  %v191_v3 = vld [vmem:[#allocation5 + $0x160] sm:$0xff]  ;;  %v1029_v5 = vpack.c.bf16 %v186_v62, %v183_v61  ;;  %v189_v7 = vld [vmem:[#allocation5 + $0x150] sm:$0xff] }
  0x5a   :  { %v194_v4 = vld [vmem:[#allocation5 + $0x178] sm:$0xff]  ;;  %v1031_v6 = vpack.c.bf16 %v193_v2, %v190_v1  ;;  %v192_v8 = vld [vmem:[#allocation5 + $0x168] sm:$0xff]  ;;  %v422_v11 = vld [vmem:[#allocation7 + $0x20] sm:$0xff] }
  0x5b   :  { %1018 = vmatpush1.bf16.msra.mxu0 %v1017_v40  ;;  %1050 = vmatpush3.bf16.msra.mxu1 %v1047_v35  ;;  %v1063_v9 = vpack.c.bf16 %v194_v4, %v191_v3  ;;  %v419_v10 = vld [vmem:[#allocation7 + $0x8] sm:$0xff]  ;;  %v420_v12 = vld [vmem:[#allocation7 + $0x10] sm:$0xff]  ;;  %v1033_v14 = vpack.c.bf16 %v192_v8, %v189_v7  ;;  %v418_v16 = vld [vmem:[#allocation7] sm:$0xff] }
  0x5c   :  { %1020 = vmatprep.subr.bf16.mxu0 %v1019_v41  ;;  %1052 = vmatprep.subr.bf16.mxu1 %v1051_v44  ;;  %v423_v13 = vld [vmem:[#allocation7 + $0x28] sm:$0xff]  ;;  %v1067_v15 = vpack.c.bf16 %v422_v11, %v419_v10  ;;  %v421_v17 = vld [vmem:[#allocation7 + $0x18] sm:$0xff]  ;;  %v428_v20 = vld [vmem:[#allocation7 + $0x50] sm:$0xff] }
  0x5d   :  { %v1099_v18 = vpack.c.bf16 %v423_v13, %v420_v12  ;;  %v425_v19 = vld [vmem:[#allocation7 + $0x38] sm:$0xff]  ;;  %v426_v21 = vld [vmem:[#allocation7 + $0x40] sm:$0xff]  ;;  %v1428_v23 = vld [vmem:[#allocation2 + $0x8] sm:$0xff]  ;;  %v1069_v24 = vpack.c.bf16 %v421_v17, %v418_v16 }
  0x5e   :  { %v429_v22 = vld [vmem:[#allocation7 + $0x58] sm:$0xff]  ;;  %v1430_v25 = vld [vmem:[#allocation2 + $0x10] sm:$0xff]  ;;  %v1071_v26 = vpack.c.bf16 %v428_v20, %v425_v19  ;;  %v427_v28 = vld [vmem:[#allocation7 + $0x48] sm:$0xff] }
  0x5f   :  { %1022 = vmatpush1.bf16.msra.mxu0 %v1021_v49  ;;  %1054 = vmatpush3.bf16.msra.mxu1 %v1051_v44  ;;  %v424_v27 = vld [vmem:[#allocation7 + $0x30] sm:$0xff]  ;;  %v1103_v29 = vpack.c.bf16 %v429_v22, %v426_v21  ;;  %v431_v30 = vld [vmem:[#allocation7 + $0x68] sm:$0xff]  ;;  %v434_v31 = vld [vmem:[#allocation7 + $0x80] sm:$0xff] }
  0x60   :  { %1024 = vmatprep.subr.bf16.mxu0 %v1023_v51  ;;  %1056 = vmatprep.subr.bf16.mxu1 %v1055_v54  ;;  %v1436_v32 = vld [vmem:[#allocation2 + $0x18] sm:$0xff]  ;;  %v1073_v33 = vpack.c.bf16 %v427_v28, %v424_v27  ;;  %v1075_v34 = vpack.c.bf16 %v434_v31, %v431_v30  ;;  %v430_v35 = vld [vmem:[#allocation7 + $0x60] sm:$0xff]  ;;  %v432_v37 = vld [vmem:[#allocation7 + $0x70] sm:$0xff] }
  0x61   :  { %v433_v36 = vld [vmem:[#allocation7 + $0x78] sm:$0xff]  ;;  %v435_v39 = vld [vmem:[#allocation7 + $0x88] sm:$0xff]  ;;  %v440_v42 = vld [vmem:[#allocation7 + $0xb0] sm:$0xff] }
  0x62   :  { %v1077_v38 = vpack.c.bf16 %v433_v36, %v430_v35  ;;  %v1107_v40 = vpack.c.bf16 %v435_v39, %v432_v37  ;;  %v437_v41 = vld [vmem:[#allocation7 + $0x98] sm:$0xff]  ;;  %v436_v44 = vld [vmem:[#allocation7 + $0x90] sm:$0xff]  ;;  %v439_v45 = vld [vmem:[#allocation7 + $0xa8] sm:$0xff] }
  0x63   :  { %1026 = vmatpush1.bf16.msra.mxu0 %v1025_v59  ;;  %1058 = vmatpush3.bf16.msra.mxu1 %v1055_v54  ;;  %v1079_v43 = vpack.c.bf16 %v440_v42, %v437_v41  ;;  %v438_v46 = vld [vmem:[#allocation7 + $0xa0] sm:$0xff]  ;;  %v1081_v47 = vpack.c.bf16 %v439_v45, %v436_v44  ;;  %v441_v48 = vld [vmem:[#allocation7 + $0xb8] sm:$0xff]  ;;  %v443_v51 = vld [vmem:[#allocation7 + $0xc8] sm:$0xff] }
  0x64   :  { %1028 = vmatprep.subr.bf16.mxu0 %v1027_v60  ;;  %1060 = vmatprep.subr.bf16.mxu1 %v1059_v63  ;;  %v1111_v49 = vpack.c.bf16 %v441_v48, %v438_v46  ;;  %v446_v52 = vld [vmem:[#allocation7 + $0xe0] sm:$0xff]  ;;  %v445_v55 = vld [vmem:[#allocation7 + $0xd8] sm:$0xff]  ;;  %v444_v56 = vld [vmem:[#allocation7 + $0xd0] sm:$0xff] }
  0x65   :  { %v1083_v53 = vpack.c.bf16 %v446_v52, %v443_v51  ;;  %v442_v54 = vld [vmem:[#allocation7 + $0xc0] sm:$0xff]  ;;  %v447_v58 = vld [vmem:[#allocation7 + $0xe8] sm:$0xff]  ;;  %v449_v60 = vld [vmem:[#allocation7 + $0xf8] sm:$0xff] }
  0x66   :  { %v1085_v57 = vpack.c.bf16 %v445_v55, %v442_v54  ;;  %v1115_v59 = vpack.c.bf16 %v447_v58, %v444_v56  ;;  %v452_v61 = vld [vmem:[#allocation7 + $0x110] sm:$0xff]  ;;  %v451_v1 = vld [vmem:[#allocation7 + $0x108] sm:$0xff]  ;;  %v450_v2 = vld [vmem:[#allocation7 + $0x100] sm:$0xff] }
  0x67   :  { %1030 = vmatpush1.bf16.msra.mxu0 %v1029_v5  ;;  %1062 = vmatpush3.bf16.msra.mxu1 %v1059_v63  ;;  %v1087_v62 = vpack.c.bf16 %v452_v61, %v449_v60  ;;  %v448_v63 = vld [vmem:[#allocation7 + $0xf0] sm:$0xff]  ;;  %v453_v4 = vld [vmem:[#allocation7 + $0x118] sm:$0xff]  ;;  %v458_v7 = vld [vmem:[#allocation7 + $0x140] sm:$0xff] }
  0x68   :  { %1032 = vmatprep.subr.bf16.mxu0 %v1031_v6  ;;  %1064 = vmatprep.subr.bf16.mxu1 %v1063_v9  ;;  %v1089_v3 = vpack.c.bf16 %v451_v1, %v448_v63  ;;  %v1119_v5 = vpack.c.bf16 %v453_v4, %v450_v2  ;;  %v455_v6 = vld [vmem:[#allocation7 + $0x128] sm:$0xff]  ;;  %v457_v10 = vld [vmem:[#allocation7 + $0x138] sm:$0xff]  ;;  %v456_v11 = vld [vmem:[#allocation7 + $0x130] sm:$0xff] }
  0x69   :  { %v1091_v8 = vpack.c.bf16 %v458_v7, %v455_v6  ;;  %v459_v13 = vld [vmem:[#allocation7 + $0x148] sm:$0xff]  ;;  %v464_v16 = vld [vmem:[#allocation7 + $0x170] sm:$0xff]  ;;  %v462_v20 = vld [vmem:[#allocation7 + $0x160] sm:$0xff] }
  0x6a   :  { %v463_v19 = vld [vmem:[#allocation7 + $0x168] sm:$0xff]  ;;  %v465_v22 = vld [vmem:[#allocation7 + $0x178] sm:$0xff]  ;;  %v826_v45 = vld [vmem:[%s1556_s2] ss:$0 sm:$0xff] }
  0x6b   :  { %1034 = vmatpush1.bf16.msra.mxu0 %v1033_v14  ;;  %1066 = vmatpush3.bf16.msra.mxu1 %v1063_v9  ;;  %v454_v9 = vld [vmem:[#allocation7 + $0x120] sm:$0xff]  ;;  %v1123_v14 = vpack.c.bf16 %v459_v13, %v456_v11  ;;  %v688_v27 = vld [vmem:[#allocation8 + $0x8] sm:$0xff] }
  0x6c   :  { %1068 = vmatprep.subr.bf16.mxu0 %v1067_v15  ;;  %1100 = vmatprep.subr.bf16.mxu1 %v1099_v18  ;;  %v1093_v12 = vpack.c.bf16 %v457_v10, %v454_v9  ;;  %v461_v15 = vld [vmem:[#allocation7 + $0x158] sm:$0xff] }
  0x6d   :  { %v1095_v17 = vpack.c.bf16 %v464_v16, %v461_v15 }
  0x6e   :  { %260 = vmatmul.mubr.f32.vlgmr.msra.gmra.mrb[0].mxu0 %v1425_v50  ;;  %922 = vmatmul.mubr.f32.vlgmr.msra.gmra.mrb[0].mxu1 %v1428_v23 }
  0x6f   :  { %265 = vmatprep.mubr.f32.mxu0 %v1315_v0  ;;  %924 = vmatprep.mubr.f32.mxu1 %v1430_v25 }
  0x70   :  { %1070 = vmatpush1.bf16.msra.mxu0 %v1069_v24  ;;  %1102 = vmatpush3.bf16.msra.mxu1 %v1099_v18  ;;  %v460_v18 = vld [vmem:[#allocation7 + $0x150] sm:$0xff]  ;;  %v1127_v24 = vpack.c.bf16 %v465_v22, %v462_v20 }
  0x71   :  { %1072 = vmatprep.subr.bf16.mxu0 %v1071_v26  ;;  %1104 = vmatprep.subr.bf16.mxu1 %v1103_v29  ;;  %v1097_v21 = vpack.c.bf16 %v463_v19, %v460_v18  ;;  %v687_v26 = vld [vmem:[#allocation8] sm:$0xff] }
  0x72   :  { %266 = vmatmul.mubr.f32.gmra.mrb[2].mxu0 %v1428_v23  ;;  %925 = vmatmul.mubr.f32.gmra.mrb[2].mxu1 %v1436_v32  ;;  %v1445_v28 = vpack.c.bf16 %v688_v27, %v687_v26 }
  0x73   :  { %271 = vmatprep.mubr.f32.mxu0 %v1315_v0 }
  0x74   :  { %1074 = vmatpush1.bf16.msra.mxu0 %v1073_v33  ;;  %1106 = vmatpush3.bf16.msra.mxu1 %v1103_v29  ;;  %v86_v29 = vlaneseq }
  0x75   :  { %1076 = vmatprep.subr.bf16.mxu0 %v1075_v34  ;;  %1108 = vmatprep.subr.bf16.mxu1 %v1107_v40 }
  0x76   :  { %272 = vmatmul.mubr.f32.gmra.mrb[4].mxu0 %v1430_v25  ;;  %v1449_v30 = vshrl.u32 %v86_v29, 7  ;;  %v689_v29 = vld [vmem:[#allocation8 + $0x10] sm:$0xff] }
  0x77   :  { %277 = vmatprep.mubr.f32.mxu0 %v1315_v0 }
  0x78   :  { %1078 = vmatpush1.bf16.msra.mxu0 %v1077_v38  ;;  %1110 = vmatpush3.bf16.msra.mxu1 %v1107_v40  ;;  %v88_v31 = vadd.s32 8, %v1449_v30  ;;  %v89_v34 = vadd.s32 16, %v1449_v30  ;;  %vm386_vm0 = vcmp.lt.s32.totalorder %v1449_v30, 7  ;;  %vm373_vm1 = vcmp.lt.s32.totalorder %v1449_v30, 1 }
  0x79   :  { %1080 = vmatprep.subr.bf16.mxu0 %v1079_v43  ;;  %1112 = vmatprep.subr.bf16.mxu1 %v1111_v49  ;;  %v90_v43 = vadd.s32 24, %v1449_v30 }
  0x7a   :  { %278 = vmatmul.mubr.f32.gmra.mrb[6].mxu0 %v1436_v32  ;;  %v102_v40 = vand.u32 15, %v88_v31  ;;  %v109_v42 = vand.u32 15, %v89_v34  ;;  %v690_v31 = vld [vmem:[#allocation8 + $0x18] sm:$0xff] }
  0x7b   :  { %530 = vmatprep.mubr.f32.mxu0 %v1315_v0  ;;  %v116_v61 = vand.u32 15, %v90_v43  ;;  %v695_v43 = vld [vmem:[#allocation8 + $0x40] sm:$0xff] }
  0x7c   :  { %1082 = vmatpush1.bf16.msra.mxu0 %v1081_v47  ;;  %1114 = vmatpush3.bf16.msra.mxu1 %v1111_v49  ;;  %vm1463_vm2 = vcmp.ne.s32.totalorder %v102_v40, 15  ;;  %vm1469_vm3 = vcmp.ne.s32.totalorder %v109_v42, 0  ;;  %v694_v42 = vld [vmem:[#allocation8 + $0x38] sm:$0xff] }
  0x7d   :  { %1084 = vmatprep.subr.bf16.mxu0 %v1083_v53  ;;  %1116 = vmatprep.subr.bf16.mxu1 %v1115_v59  ;;  %vm1484_vm4 = vcmp.ne.s32.totalorder %v116_v61, 15 }
  0x80   :  { %1086 = vmatpush1.bf16.msra.mxu0 %v1085_v57  ;;  %1118 = vmatpush3.bf16.msra.mxu1 %v1115_v59 }
  0x81   :  { %1088 = vmatprep.subr.bf16.mxu0 %v1087_v62  ;;  %1120 = vmatprep.subr.bf16.mxu1 %v1119_v5 }
  0x84   :  { %1090 = vmatpush1.bf16.msra.mxu0 %v1089_v3  ;;  %1122 = vmatpush3.bf16.msra.mxu1 %v1119_v5  ;;  %v95_v3 = vand.u32 15, %v1449_v30  ;;  %v828_v30 = vld [vmem:[%s1560_s6] ss:$0 sm:$0xff]  ;;  %s1277_s6 = scalar_lea.vmem %s813_s9, 512 }
  0x85   :  { %1092 = vmatprep.subr.bf16.mxu0 %v1091_v8  ;;  %1124 = vmatprep.subr.bf16.mxu1 %v1123_v14  ;;  %p1278_p4 = scmp.ne.s32.totalorder %s813_s9, %s1277_s6  ;;  %p1283_p6 = scmp.lt.s32.totalorder %s1277_s6, %s1277_s6 }
  0x86   :  { %vm1488_vm5 = vcmp.ne.s32.totalorder %v95_v3, 0 }
  0x87   :  { %p1284_p7 = por %p1283_p6, %p1282_p5 }
  0x88   :  { %1094 = vmatpush1.bf16.msra.mxu0 %v1093_v12  ;;  %1126 = vmatpush3.bf16.msra.mxu1 %v1123_v14 }
  0x89   :  { %1096 = vmatprep.subr.bf16.mxu0 %v1095_v17  ;;  %1128 = vmatprep.subr.bf16.mxu1 %v1127_v24  ;;  %p1285_p8 = pnand %p1284_p7, %p1278_p4 }
  0x8c   :  { %1098 = vmatpush1.bf16.msra.mxu0 %v1097_v21  ;;  %1130 = vmatpush3.bf16.msra.mxu1 %v1127_v24 }
  0x8d   :  { %1163 = vmatprep.subr.bf16.mxu1 %v1445_v28  ;;  %1132 = vmatprep.subr.bf16.mxu0 %v1445_v28 }
 0x141   :  { %v261_v33 = vpop.f32.mrb[0].mxu0  ;;  %v923_v36 = vpop.f32.mrb[0].mxu1 }
 0x142   :  { %v263_v35 = vpop.f32.mrb[1].mxu0  ;;  %v350_v37 = vpop.f32.mrb[1].mxu1  ;;  %v383_v38 = vrot.slane %v923_v36, 1  ;;  %v369_v44 = vrot.slane %v261_v33, 7 }
 0x143   :  { %v382_v39 = vrot.slane %v350_v37, 1  ;;  %v402_v15 = vadd.f32 %v826_v45, %v263_v35  ;;  %v1135_v35 = vpack.c.bf16 %v690_v31, %v689_v29  ;;  %v691_v37 = vld [vmem:[#allocation8 + $0x20] sm:$0xff] }
 0x145   :  { %v267_v41 = vpop.f32.mrb[2].mxu0  ;;  %v389_v46 = vsel %vm386_vm0, %v382_v39, %v383_v38  ;;  %v926_v48 = vpop.f32.mrb[2].mxu1 }
 0x146   :  { %v370_v47 = vrot.slane %v267_v41, 7  ;;  %v269_v49 = vpop.f32.mrb[3].mxu0  ;;  %v385_v51 = vrot.slane %v926_v48, 1  ;;  %v360_v53 = vpop.f32.mrb[3].mxu1  ;;  %v693_v41 = vld [vmem:[#allocation8 + $0x30] sm:$0xff]  ;;  %v699_v48 = vld [vmem:[#allocation8 + $0x60] sm:$0xff] }
 0x147   :  { %v403_v52 = vadd.f32 %v826_v45, %v269_v49  ;;  %v384_v56 = vrot.slane %v360_v53, 1  ;;  %v700_v49 = vld [vmem:[#allocation8 + $0x68] sm:$0xff]  ;;  %v702_v53 = vld [vmem:[#allocation8 + $0x78] sm:$0xff] }
 0x148   :  { %v376_v54 = vsel %vm373_vm1, %v369_v44, %v370_v47  ;;  %v390_v57 = vsel %vm386_vm0, %v385_v51, %v382_v39 }
 0x149   :  { %v407_v58 = vadd.f32 %v403_v52, %v376_v54  ;;  %v273_v59 = vpop.f32.mrb[4].mxu0  ;;  %v387_v62 = vsel %vm386_vm0, %v384_v56, %v385_v51  ;;  %v388_v63 = vsel %vm386_vm0, %v383_v38, %v384_v56  ;;  %v394_v20 = vsel %vm1484_vm4, %v390_v57, 0.0  ;;  %v692_v38 = vld [vmem:[#allocation8 + $0x28] sm:$0xff]  ;;  %v701_v52 = vld [vmem:[#allocation8 + $0x70] sm:$0xff] }
 0x14a   :  { %v371_v1 = vrot.slane %v273_v59, 7  ;;  %v275_v2 = vpop.f32.mrb[5].mxu0  ;;  %v392_v4 = vsel %vm1463_vm2, %v388_v63, 0.0  ;;  %v1139_v40 = vpack.c.bf16 %v692_v38, %v691_v37  ;;  %v1155_v51 = vpack.c.bf16 %v700_v49, %v699_v48 }
 0x14b   :  { %v404_v5 = vadd.f32 %v826_v45, %v275_v2  ;;  %v411_v6 = vadd.f32 %v407_v58, %v392_v4  ;;  %v1159_v54 = vpack.c.bf16 %v702_v53, %v701_v52  ;;  %v827_v2 = vld [vmem:[%s1558_s4] ss:$0 sm:$0xff] }
 0x14c   :  { %v375_v7 = vsel %vm373_vm1, %v370_v47, %v371_v1  ;;  %v698_v47 = vld [vmem:[#allocation8 + $0x58] sm:$0xff] }
 0x14d   :  { %v380_v8 = vsel %vm1469_vm3, %v375_v7, 0.0  ;;  %v279_v9 = vpop.f32.mrb[6].mxu0  ;;  %v415_v34 = vmax.f32 %v411_v6, 0.0 }
 0x14e   :  { %v408_v11 = vadd.f32 %v404_v5, %v380_v8  ;;  %v372_v13 = vrot.slane %v279_v9, 7  ;;  %v281_v14 = vpop.f32.mrb[7].mxu0 }
 0x14f   :  { %v405_v16 = vadd.f32 %v826_v45, %v281_v14 }
 0x150   :  { %v377_v17 = vsel %vm373_vm1, %v372_v13, %v369_v44  ;;  %v374_v18 = vsel %vm373_vm1, %v371_v1, %v372_v13  ;;  %v412_v19 = vadd.f32 %v408_v11, %v387_v62  ;;  %v696_v44 = vld [vmem:[#allocation8 + $0x48] sm:$0xff] }
 0x151   :  { %v378_v21 = vsel %vm1488_vm5, %v377_v17, 0.0  ;;  %v409_v22 = vadd.f32 %v405_v16, %v374_v18  ;;  %v1147_v45 = vpack.c.bf16 %v696_v44, %v695_v43 }
 0x152   :  { %v406_v24 = vadd.f32 %v402_v15, %v378_v21  ;;  %v416_v36 = vmax.f32 %v412_v19, 0.0 }
 0x153   :  { %v413_v26 = vadd.f32 %v409_v22, %v394_v20 }
 0x154   :  { %v410_v27 = vadd.f32 %v406_v24, %v389_v46  ;;  %v697_v46 = vld [vmem:[#allocation8 + $0x50] sm:$0xff] }
 0x155   :  { %v417_v39 = vmax.f32 %v413_v26, 0.0 }
 0x156   :  { %v414_v33 = vmax.f32 %v410_v27, 0.0 }
 0x158   :  { %531 = vmatmul.mubr.f32.vlgmr.msra.gmra.mrb[8].mxu0 %v414_v33  ;;  %959 = vmatprep.mubr.f32.mxu1 %v414_v33 }
 0x159   :  { %960 = vmatmul.mubr.f32.vlgmr.msra.gmra.mrb[4].mxu1 %v415_v34  ;;  %536 = vmatprep.mubr.f32.mxu0 %v1315_v0 }
 0x15a   :  { %962 = vmatprep.mubr.f32.mxu1 %v416_v36  ;;  %1171 = vmatpush3.bf16.msra.mxu1 %v1445_v28 }
 0x15b   :  { %1134 = vmatpush3.bf16.msra.mxu0 %v1445_v28  ;;  %1164 = vmatprep.subr.bf16.mxu1 %v1135_v35  ;;  %v1143_v28 = vpack.c.bf16 %v694_v42, %v693_v41 }
 0x15c   :  { %537 = vmatmul.mubr.f32.gmra.mrb[10].mxu0 %v415_v34  ;;  %1136 = vmatprep.subr.bf16.mxu0 %v1135_v35 }
 0x15d   :  { %963 = vmatmul.mubr.f32.gmra.mrb[6].mxu1 %v417_v39  ;;  %542 = vmatprep.mubr.f32.mxu0 %v1315_v0 }
 0x15e   :  { %1172 = vmatpush3.bf16.msra.mxu1 %v1135_v35 }
 0x15f   :  { %1138 = vmatpush3.bf16.msra.mxu0 %v1135_v35  ;;  %1165 = vmatprep.subr.bf16.mxu1 %v1139_v40 }
 0x160   :  { %543 = vmatmul.mubr.f32.gmra.mrb[12].mxu0 %v416_v36  ;;  %1140 = vmatprep.subr.bf16.mxu0 %v1139_v40 }
 0x161   :  { %548 = vmatprep.mubr.f32.mxu0 %v1315_v0  ;;  %v1151_v0 = vpack.c.bf16 %v698_v47, %v697_v46 }
 0x162   :  { %1173 = vmatpush3.bf16.msra.mxu1 %v1139_v40 }
 0x163   :  { %1142 = vmatpush3.bf16.msra.mxu0 %v1139_v40  ;;  %1166 = vmatprep.subr.bf16.mxu1 %v1143_v28 }
 0x164   :  { %549 = vmatmul.mubr.f32.gmra.mrb[14].mxu0 %v417_v39  ;;  %1144 = vmatprep.subr.bf16.mxu0 %v1143_v28 }
 0x166   :  { %1174 = vmatpush3.bf16.msra.mxu1 %v1143_v28 }
 0x167   :  { %1146 = vmatpush3.bf16.msra.mxu0 %v1143_v28  ;;  %1167 = vmatprep.subr.bf16.mxu1 %v1147_v45 }
 0x168   :  { %1148 = vmatprep.subr.bf16.mxu0 %v1147_v45 }
 0x16a   :  { %1175 = vmatpush3.bf16.msra.mxu1 %v1147_v45 }
 0x16b   :  { %1150 = vmatpush3.bf16.msra.mxu0 %v1147_v45  ;;  %1168 = vmatprep.subr.bf16.mxu1 %v1151_v0 }
 0x16c   :  { %1152 = vmatprep.subr.bf16.mxu0 %v1151_v0 }
 0x16e   :  { %1176 = vmatpush3.bf16.msra.mxu1 %v1151_v0 }
 0x16f   :  { %1154 = vmatpush3.bf16.msra.mxu0 %v1151_v0  ;;  %1169 = vmatprep.subr.bf16.mxu1 %v1155_v51 }
 0x170   :  { %1156 = vmatprep.subr.bf16.mxu0 %v1155_v51 }
 0x172   :  { %1177 = vmatpush3.bf16.msra.mxu1 %v1155_v51 }
 0x173   :  { %1158 = vmatpush3.bf16.msra.mxu0 %v1155_v51  ;;  %1170 = vmatprep.subr.bf16.mxu1 %v1159_v54 }
 0x174   :  { %1160 = vmatprep.subr.bf16.mxu0 %v1159_v54 }
 0x176   :  { %1178 = vmatpush3.bf16.msra.mxu1 %v1159_v54 }
 0x177   :  { %1162 = vmatpush3.bf16.msra.mxu0 %v1159_v54 }
 0x22b   :  { %v532_v56 = vpop.f32.mrb[8].mxu0 }
 0x22c   :  { %v534_v57 = vpop.f32.mrb[9].mxu0  ;;  %v961_v58 = vpop.f32.mrb[4].mxu1  ;;  %v640_v1 = vrot.slane %v532_v56, 7 }
 0x22d   :  { %v653_v59 = vrot.slane %v961_v58, 1  ;;  %v621_v61 = vpop.f32.mrb[5].mxu1  ;;  %v671_v36 = vadd.f32 %v827_v2, %v534_v57 }
 0x22e   :  { %v652_v62 = vrot.slane %v621_v61, 1 }
 0x22f   :  { %v538_v63 = vpop.f32.mrb[10].mxu0 }
 0x230   :  { %v658_v3 = vsel %vm386_vm0, %v652_v62, %v653_v59  ;;  %v641_v4 = vrot.slane %v538_v63, 7  ;;  %v540_v5 = vpop.f32.mrb[11].mxu0  ;;  %v964_v6 = vpop.f32.mrb[6].mxu1 }
 0x231   :  { %v672_v7 = vadd.f32 %v827_v2, %v540_v5  ;;  %v655_v8 = vrot.slane %v964_v6, 1  ;;  %v631_v9 = vpop.f32.mrb[7].mxu1 }
 0x232   :  { %v646_v11 = vsel %vm373_vm1, %v640_v1, %v641_v4  ;;  %v654_v13 = vrot.slane %v631_v9, 1 }
 0x233   :  { %v676_v14 = vadd.f32 %v672_v7, %v646_v11  ;;  %v659_v15 = vsel %vm386_vm0, %v655_v8, %v652_v62  ;;  %v544_v16 = vpop.f32.mrb[12].mxu0 }
 0x234   :  { %v656_v17 = vsel %vm386_vm0, %v654_v13, %v655_v8  ;;  %v657_v18 = vsel %vm386_vm0, %v653_v59, %v654_v13  ;;  %v642_v19 = vrot.slane %v544_v16, 7  ;;  %v546_v20 = vpop.f32.mrb[13].mxu0  ;;  %v663_v60 = vsel %vm1484_vm4, %v659_v15, 0.0 }
 0x235   :  { %v661_v21 = vsel %vm1463_vm2, %v657_v18, 0.0  ;;  %v673_v22 = vadd.f32 %v827_v2, %v546_v20 }
 0x236   :  { %v680_v24 = vadd.f32 %v676_v14, %v661_v21  ;;  %v645_v26 = vsel %vm373_vm1, %v641_v4, %v642_v19 }
 0x237   :  { %v650_v27 = vsel %vm1469_vm3, %v645_v26, 0.0  ;;  %v550_v29 = vpop.f32.mrb[14].mxu0 }
 0x238   :  { %v677_v31 = vadd.f32 %v673_v22, %v650_v27  ;;  %v643_v33 = vrot.slane %v550_v29, 7  ;;  %v552_v34 = vpop.f32.mrb[15].mxu0  ;;  %v684_v46 = vmax.f32 %v680_v24, 0.0 }
 0x239   :  { %v674_v35 = vadd.f32 %v827_v2, %v552_v34 }
 0x23a   :  { %v647_v37 = vsel %vm373_vm1, %v643_v33, %v640_v1  ;;  %v644_v55 = vsel %vm373_vm1, %v642_v19, %v643_v33  ;;  %v681_v38 = vadd.f32 %v677_v31, %v656_v17 }
 0x23b   :  { %v648_v39 = vsel %vm1488_vm5, %v647_v37, 0.0  ;;  %v678_v40 = vadd.f32 %v674_v35, %v644_v55 }
 0x23c   :  { %v685_v41 = vmax.f32 %v681_v38, 0.0  ;;  %v675_v42 = vadd.f32 %v671_v36, %v648_v39 }
 0x23d   :  { %v682_v28 = vadd.f32 %v678_v40, %v663_v60 }
 0x23e   :  { %1000 = vmatprep.mubr.f32.mxu1 %v685_v41  ;;  %v679_v43 = vadd.f32 %v675_v42, %v658_v3 }
 0x23f   :  { %v686_v44 = vmax.f32 %v682_v28, 0.0 }
 0x240   :  { %v683_v45 = vmax.f32 %v679_v43, 0.0 }
 0x241   :  { %1001 = vmatmul.mubr.f32.vlgmr.msra.gmra.mrb[8].mxu1 %v686_v44 }
 0x242   :  { %997 = vmatprep.mubr.f32.mxu0 %v683_v45 }
 0x243   :  { %998 = vmatmul.mubr.f32.vlgmr.msra.gmra.mrb[16].mxu0 %v684_v46 }
 0x314   :  { %v1002_v12 = vpop.f32.mrb[8].mxu1 }
 0x315   :  { %v792_v47 = vadd.f32 %v1002_v12, %v828_v30  ;;  %v786_v0 = vpop.f32.mrb[9].mxu1 }
 0x316   :  { %v787_v10 = vadd.f32 %v828_v30, %v786_v0  ;;  %v999_v48 = vpop.f32.mrb[16].mxu0 }
 0x317   :  { %v798_v49 = vadd.f32 %v792_v47, %v1436_v32  ;;  %v782_v51 = vadd.f32 %v999_v48, %v828_v30  ;;  %v776_v52 = vpop.f32.mrb[17].mxu0 }
 0x318   :  { %v797_v53 = vadd.f32 %v787_v10, %v1430_v25  ;;  %v777_v54 = vadd.f32 %v828_v30, %v776_v52 }
 0x319   :  { %v802_v56 = vmax.f32 %v798_v49, 0.0  ;;  %v796_v57 = vadd.f32 %v782_v51, %v1428_v23 }
 0x31a   :  { %v801_v58 = vmax.f32 %v797_v53, 0.0  ;;  %v795_v59 = vadd.f32 %v777_v54, %v1425_v50 }
 0x31b   :  { %806 = vst [vmem:[#allocation10 + $0x18] sm:$0xff] %v802_v56  ;;  %v800_v61 = vmax.f32 %v796_v57, 0.0 }
 0x31c   :  { %805 = vst [vmem:[#allocation10 + $0x10] sm:$0xff] %v801_v58  ;;  %v799_v62 = vmax.f32 %v795_v59, 0.0 }
 0x31d   :  { %804 = vst [vmem:[#allocation10 + $0x8] sm:$0xff] %v800_v61 }
 0x31e   :  { %803 = vst [vmem:[#allocation10] sm:$0xff] %v799_v62 }
 0x31f   :  { %1288 = shalt.err (!%p1285_p8)
}
 0x320   :  { %s1289_s14 = scalar_lea.hbm %s1561_s7, 512 }
 0x321   :  { %p1290_p9 = scmp.ne.s32.totalorder %s1561_s7, %s1289_s14  ;;  %p1293_p10 = scmp.lt.u32.totalorder %s1289_s14, %s1561_s7 }
 0x323   :  { %p1295_p11 = pnand %p1293_p10, %p1290_p9 }
 0x325   :  { %1298 = shalt.err (!%p1295_p11)
}
 0x326   :  { %818 = dma.vmem_to_hbm [thread:$0]  %s813_s9, 512, %s1561_s7, [#allocation4], %s1311_s1, %s1311_s1, %s1312_s25  }
 0x327   :  { %1305 = dma.done.wait [#allocation4], 512  }
 0x328   :  { %1306 = vsyncadd [#allocation4], 4294966784 }
 0x329   :  { %822 = vsyncpa [#allocation3], 1 }
 0x32a   :  { %823 = vsyncpa [#allocation6], 1 }
 0x32b   :  { %824 = vsyncpa [#allocation9], 1 }
 0x32c   :  { %825 = vsyncpa [#allocation4], 1 }

</bundles_post_ra>
